<compile_context>
chip_gen: v5e
topology: v5e:2x2
jax: 0.10.0
libtpu: 0.0.40
codegen_flags: <defaults>
</compile_context>

<pallas_src>
import functools

import jax
import jax.numpy as jnp
from jax import lax
from jax.experimental import pallas as pl
from jax.experimental.pallas import tpu as pltpu


def _round_up(v: int, m: int) -> int:
    return ((v + m - 1) // m) * m


def _vmem_capacity_bytes() -> int:
    try:
        return int(pltpu.get_tpu_info().vmem_capacity_bytes)
    except Exception:
        return 64 * 1024 * 1024  # conservative fallback (v7x per-TC VMEM)


# --------------------------------------------------------------------------- #
# Kernels
# --------------------------------------------------------------------------- #
def _mlp_mean_kernel(x_ref, w_ref, b_ref, o_ref, acc_ref, *,
                     seq_len, tile_s, needs_mask):
    # x_ref:   (tB, tS, D)     w_ref: (D, O_pad)    b_ref: (1, O_pad)
    # o_ref:   (tB, O_pad)     acc_ref: (tB, sub, D) f32 partial seq-sums
    s = pl.program_id(1)
    last = pl.num_programs(1) - 1
    sub = acc_ref.shape[1]

    @pl.when(s == 0)
    def _init():
        acc_ref[...] = jnp.zeros_like(acc_ref)

    def _accumulate(x):
        # Pure vreg adds in the streaming loop; the one cross-sublane (XLU)
        # reduce is deferred to the finalize step.
        tb, ts, d = x.shape
        if sub == 1:
            acc_ref[...] += jnp.sum(x, axis=1, keepdims=True)
        else:
            acc_ref[...] += jnp.sum(x.reshape(tb, ts // sub, sub, d), axis=1)

    if needs_mask:
        @pl.when(s != last)
        def _full_tile():
            _accumulate(x_ref[...].astype(jnp.float32))

        @pl.when(s == last)
        def _padded_tile():
            x = x_ref[...].astype(jnp.float32)
            pos = s * tile_s + lax.broadcasted_iota(
                jnp.int32, (1, tile_s, x.shape[-1]), 1)
            _accumulate(jnp.where(pos < seq_len, x, 0.0))
    else:
        _accumulate(x_ref[...].astype(jnp.float32))

    @pl.when(s == last)
    def _finalize():
        # Single cross-sublane reduce + exactly one MXU matmul per batch tile.
        xm = jnp.sum(acc_ref[...], axis=1) * (1.0 / float(seq_len))  # (tB, D) mean
        y = jnp.dot(xm.astype(w_ref.dtype), w_ref[...],
                    preferred_element_type=jnp.float32)              # (tB, O_pad)
        o_ref[...] = (y + b_ref[...].astype(jnp.float32)).astype(o_ref.dtype)


def _mlp_nomean_kernel(x_ref, w_ref, b_ref, o_ref):
    # 2-D input path (module semantics: no mean): o = x @ W_t + b
    y = jnp.dot(x_ref[...].astype(w_ref.dtype), w_ref[...],
                preferred_element_type=jnp.float32)
    o_ref[...] = (y + b_ref[...].astype(jnp.float32)).astype(o_ref.dtype)


# --------------------------------------------------------------------------- #
# Wrappers
# --------------------------------------------------------------------------- #
def init_mlp_params(weight, bias):
    """One-time param prep (outside the hot path): transpose weight to (D, O_pad)
    and zero-pad the output dim to a lane-dense multiple of 128."""
    O, D = weight.shape
    assert bias.shape == (O,)
    O_pad = max(128, _round_up(O, 128))
    w_t = jnp.asarray(weight).T                     # (D, O)
    b = jnp.asarray(bias)
    if O_pad != O:
        w_t = jnp.pad(w_t, ((0, 0), (0, O_pad - O)))
        b = jnp.pad(b, (0, O_pad - O))
    return {"w_t": w_t, "b": b.reshape(1, O_pad), "out_dim": O}


def _choose_tiles(B, S, D, itemsize, x_buf_budget, tile_b, tile_s):
    if tile_b is None:
        if B <= 8:
            tile_b = B
        else:
            # >= 2 batch tiles so the "parallel" axis can shard across the two
            # TensorCores of a v7x chip; cap at 256 (MXU-friendly).
            tile_b = min(256, _round_up(pl.cdiv(B, 2), 8))
    if tile_s is None:
        max_ts = x_buf_budget // max(1, tile_b * D * itemsize)
        max_ts = max(8, (max_ts // 8) * 8)
        if S <= max_ts:
            tile_s = _round_up(S, 8)            # single (possibly padded) seq tile
        else:
            tile_s = max_ts
            # Prefer a multiple of 8 that divides S: the mask compiles away and
            # no padded rows are ever DMA'd.
            for ts in range(max_ts, max(7, max_ts - 8 * 512), -8):
                if S % ts == 0:
                    tile_s = ts
                    break
    return tile_b, tile_s


def mlp_forward(x, params, *, tile_b=None, tile_s=None):
    """
    x:      (B, S, D) or (B, D)
    params: output of init_mlp_params(weight, bias)
    returns (B, O)
    """
    w_t, b_p, out_dim = params["w_t"], params["b"], params["out_dim"]
    D, O_pad = w_t.shape
    vmem_cap = _vmem_capacity_bytes()

    # ---- 2-D input (or length-1 seq): plain Linear, no reduction machinery ----
    if x.ndim == 2 or (x.ndim == 3 and x.shape[1] == 1):
        x2 = x if x.ndim == 2 else x[:, 0, :]
        B, Dx = x2.shape
        assert Dx == D
        if tile_b is None:
            tB = B if B <= 8 else min(256, _round_up(pl.cdiv(B, 2), 8))
        else:
            tB = tile_b
        need = (2 * tB * D * x2.dtype.itemsize
                + 2 * D * O_pad * w_t.dtype.itemsize
                + 2 * O_pad * b_p.dtype.itemsize
                + 2 * tB * O_pad * x2.dtype.itemsize)
        vmem_limit = int(min(max(need * 1.4 + (4 << 20), 16 << 20),
                             vmem_cap * 3 // 4))
        out = pl.pallas_call(
            _mlp_nomean_kernel,
            out_shape=jax.ShapeDtypeStruct((B, O_pad), x2.dtype),
            grid_spec=pltpu.PrefetchScalarGridSpec(
                num_scalar_prefetch=0,
                grid=(pl.cdiv(B, tB),),
                in_specs=[
                    pl.BlockSpec((tB, D), lambda b: (b, 0)),
                    pl.BlockSpec((D, O_pad), lambda b: (0, 0)),
                    pl.BlockSpec((1, O_pad), lambda b: (0, 0)),
                ],
                out_specs=pl.BlockSpec((tB, O_pad), lambda b: (b, 0)),
            ),
            compiler_params=pltpu.CompilerParams(
                dimension_semantics=("parallel",),
                vmem_limit_bytes=vmem_limit),
        )(x2, w_t, b_p)
        return out[:, :out_dim] if O_pad != out_dim else out

    # ---- 3-D input: mean over seq, then Linear ----
    B, S, Dx = x.shape
    assert Dx == D

    x_buf_budget = max(2 << 20, vmem_cap // 8)      # per x double-buffer slot
    tB, tS = _choose_tiles(B, S, D, x.dtype.itemsize, x_buf_budget, tile_b, tile_s)
    sub = 8 if (tS % 8 == 0) else 1
    needs_mask = (S % tS) != 0
    grid = (pl.cdiv(B, tB), pl.cdiv(S, tS))

    # TODO(synk): very large O_pad*D layers (resident weight approaching VMEM/3)
    # would need an extra O-tiling grid axis; not needed for typical head sizes.
    need = (2 * tB * tS * D * x.dtype.itemsize       # x double buffers
            + 2 * D * O_pad * w_t.dtype.itemsize     # resident weight
            + 2 * O_pad * b_p.dtype.itemsize         # resident bias
            + 2 * tB * O_pad * x.dtype.itemsize      # output
            + tB * sub * D * 4)                      # f32 accumulator scratch
    vmem_limit = int(min(max(need * 1.4 + (4 << 20), 16 << 20), vmem_cap * 3 // 4))

    kernel = functools.partial(_mlp_mean_kernel, seq_len=S, tile_s=tS,
                               needs_mask=needs_mask)

    out = pl.pallas_call(
        kernel,
        out_shape=jax.ShapeDtypeStruct((B, O_pad), x.dtype),
        grid_spec=pltpu.PrefetchScalarGridSpec(
            num_scalar_prefetch=0,
            grid=grid,
            in_specs=[
                # x streams over (batch, seq) tiles.
                pl.BlockSpec((tB, tS, D), lambda b, s: (b, s, 0)),
                # Weight / bias: constant index_map -> resident in VMEM.
                pl.BlockSpec((D, O_pad), lambda b, s: (0, 0)),
                pl.BlockSpec((1, O_pad), lambda b, s: (0, 0)),
            ],
            out_specs=pl.BlockSpec((tB, O_pad), lambda b, s: (b, 0)),
            scratch_shapes=[pltpu.VMEM((tB, sub, D), jnp.float32)],
        ),
        compiler_params=pltpu.CompilerParams(
            dimension_semantics=("parallel", "arbitrary"),
            vmem_limit_bytes=vmem_limit),
    )(x, w_t, b_p)

    return out[:, :out_dim] if O_pad != out_dim else out


if __name__ == "__main__":
    key = jax.random.PRNGKey(0)
    kx, kw, kb, kx2, kx3 = jax.random.split(key, 5)

    # Shapes consistent with the module: (batch, seq_len, input_dim) -> (batch, output_dim)
    batch, seq, input_dim, output_dim = 2, 8, 32, 16

    x = jax.random.normal(kx, (batch, seq, input_dim), dtype=jnp.float32)
    bound = 1.0 / jnp.sqrt(jnp.float32(input_dim))
    weight = jax.random.uniform(kw, (output_dim, input_dim),
                                minval=-bound, maxval=bound, dtype=jnp.float32)
    bias = jax.random.uniform(kb, (output_dim,),
                              minval=-bound, maxval=bound, dtype=jnp.float32)

    params = init_mlp_params(weight, bias)   # one-time prep, outside the hot path

    # 1) Single seq tile, no masking.
    out = mlp_forward(x, params)
    jax.block_until_ready(out)
    ref = jnp.mean(x, axis=1) @ weight.T + bias
    assert out.shape == (batch, output_dim)
    assert jnp.allclose(out, ref, atol=1e-5, rtol=1e-5)

    # 2) Multi-seq-tile path with a non-dividing last tile (exercises the
    #    accumulator init/finalize and the last-tile-only pad masking).
    batch2, seq2 = 4, 20
    x2 = jax.random.normal(kx2, (batch2, seq2, input_dim), dtype=jnp.float32)
    out2 = mlp_forward(x2, params, tile_s=8)
    jax.block_until_ready(out2)
    ref2 = jnp.mean(x2, axis=1) @ weight.T + bias
    assert out2.shape == (batch2, output_dim)
    assert jnp.allclose(out2, ref2, atol=1e-5, rtol=1e-5)

    # 3) 2-D input path (module skips the mean): dedicated no-mean kernel.
    x3 = jax.random.normal(kx3, (batch, input_dim), dtype=jnp.float32)
    out3 = mlp_forward(x3, params)
    jax.block_until_ready(out3)
    ref3 = x3 @ weight.T + bias
    assert out3.shape == (batch, output_dim)
    assert jnp.allclose(out3, ref3, atol=1e-5, rtol=1e-5)

    print("KERNEL_OK")
</pallas_src>

<mosaic_0001>
module attributes {stable_mosaic.version = 11 : i64} {
  func.func @_mlp_mean_kernel(%arg0: i32, %arg1: i32, %arg2: memref<2x8x32xf32, #tpu.memory_space<vmem>>, %arg3: memref<32x128xf32, #tpu.memory_space<vmem>>, %arg4: memref<1x128xf32, #tpu.memory_space<vmem>>, %arg5: memref<2x128xf32, #tpu.memory_space<vmem>>, %arg6: memref<2x8x32xf32, #tpu.memory_space<vmem>>) attributes {dimension_semantics = [#tpu.dimension_semantics<parallel>, #tpu.dimension_semantics<arbitrary>], iteration_bounds = array<i64: 1, 1>, scalar_prefetch = 0 : i64, scratch_operands = 1 : i64, tpu.core_type = #tpu.core_type<tc>, window_params = [{transform_indices = @transform_0, window_bounds = array<i64: 2, 8, 32>}, {pipeline_mode = #tpu.pipeline_mode<synchronous>, transform_indices = @transform_1, window_bounds = array<i64: 32, 128>}, {pipeline_mode = #tpu.pipeline_mode<synchronous>, transform_indices = @transform_2, window_bounds = array<i64: 1, 128>}, {transform_indices = @transform_3, window_bounds = array<i64: 2, 128>}]} {
    %c0_i32 = arith.constant 0 : i32
    %0 = arith.cmpi eq, %arg1, %c0_i32 : i32
    %1 = arith.extui %0 : i1 to i32
    %c0_i32_0 = arith.constant 0 : i32
    %2 = arith.cmpi ne, %1, %c0_i32_0 : i32
    scf.if %2 {
      %cst_11 = arith.constant 0.000000e+00 : f32
      %12 = vector.broadcast %cst_11 : f32 to vector<2x8x32xf32>
      %c0_12 = arith.constant 0 : index
      %c0_13 = arith.constant 0 : index
      %c0_14 = arith.constant 0 : index
      %13 = vector.load %arg6[%c0_12, %c0_13, %c0_14] : memref<2x8x32xf32, #tpu.memory_space<vmem>>, vector<2x8x32xf32>
      tpu.vector_store %arg6[%c0_12, %c0_13, %c0_14], %12 {strides = array<i32>} : memref<2x8x32xf32, #tpu.memory_space<vmem>>, vector<2x8x32xf32>,
    } else {
    }
    %c0 = arith.constant 0 : index
    %c0_1 = arith.constant 0 : index
    %c0_2 = arith.constant 0 : index
    %3 = vector.load %arg2[%c0, %c0_1, %c0_2] : memref<2x8x32xf32, #tpu.memory_space<vmem>>, vector<2x8x32xf32>
    %c0_3 = arith.constant 0 : index
    %c0_4 = arith.constant 0 : index
    %c0_5 = arith.constant 0 : index
    %4 = vector.load %arg6[%c0_3, %c0_4, %c0_5] : memref<2x8x32xf32, #tpu.memory_space<vmem>>, vector<2x8x32xf32>
    %5 = vector.shape_cast %3 : vector<2x8x32xf32> to vector<2x1x8x32xf32>
    %cst = arith.constant dense<0.000000e+00> : vector<2x8x32xf32>
    %6 = vector.multi_reduction <add>, %5, %cst [1] : vector<2x1x8x32xf32> to vector<2x8x32xf32>
    %7 = arith.addf %4, %6 : vector<2x8x32xf32>
    %c0_6 = arith.constant 0 : index
    %c0_7 = arith.constant 0 : index
    %c0_8 = arith.constant 0 : index
    %8 = vector.load %arg6[%c0_6, %c0_7, %c0_8] : memref<2x8x32xf32, #tpu.memory_space<vmem>>, vector<2x8x32xf32>
    tpu.vector_store %arg6[%c0_6, %c0_7, %c0_8], %7 {strides = array<i32>} : memref<2x8x32xf32, #tpu.memory_space<vmem>>, vector<2x8x32xf32>,
    %c0_i32_9 = arith.constant 0 : i32
    %9 = arith.cmpi eq, %arg1, %c0_i32_9 : i32
    %10 = arith.extui %9 : i1 to i32
    %c0_i32_10 = arith.constant 0 : i32
    %11 = arith.cmpi ne, %10, %c0_i32_10 : i32
    scf.if %11 {
      %c0_11 = arith.constant 0 : index
      %c0_12 = arith.constant 0 : index
      %c0_13 = arith.constant 0 : index
      %12 = vector.load %arg6[%c0_11, %c0_12, %c0_13] : memref<2x8x32xf32, #tpu.memory_space<vmem>>, vector<2x8x32xf32>
      %cst_14 = arith.constant dense<0.000000e+00> : vector<2x32xf32>
      %13 = vector.multi_reduction <add>, %12, %cst_14 [1] : vector<2x8x32xf32> to vector<2x32xf32>
      %cst_15 = arith.constant 1.250000e-01 : f32
      %14 = vector.broadcast %cst_15 : f32 to vector<2x32xf32>
      %15 = arith.mulf %13, %14 : vector<2x32xf32>
      %c0_16 = arith.constant 0 : index
      %c0_17 = arith.constant 0 : index
      %16 = vector.load %arg3[%c0_16, %c0_17] : memref<32x128xf32, #tpu.memory_space<vmem>>, vector<32x128xf32>
      %cst_18 = arith.constant dense<0.000000e+00> : vector<2x128xf32>
      %17 = tpu.matmul %15, %16, %cst_18 {dimension_numbers = #tpu.dot_dimension_numbers<[1], [0], [0], [1], [0, 0, 1, 1], [], []>} : vector<2x32xf32>, vector<32x128xf32>, vector<2x128xf32> -> vector<2x128xf32>
      %c0_19 = arith.constant 0 : index
      %c0_20 = arith.constant 0 : index
      %18 = vector.load %arg4[%c0_19, %c0_20] : memref<1x128xf32, #tpu.memory_space<vmem>>, vector<1x128xf32>
      %19 = vector.broadcast %18 : vector<1x128xf32> to vector<2x128xf32>
      %20 = arith.addf %17, %19 : vector<2x128xf32>
      %c0_21 = arith.constant 0 : index
      %c0_22 = arith.constant 0 : index
      %21 = vector.load %arg5[%c0_21, %c0_22] : memref<2x128xf32, #tpu.memory_space<vmem>>, vector<2x128xf32>
      tpu.vector_store %arg5[%c0_21, %c0_22], %20 {strides = array<i32>} : memref<2x128xf32, #tpu.memory_space<vmem>>, vector<2x128xf32>,
    } else {
    }
    return
  }
  func.func @transform_0(%arg0: i32, %arg1: i32) -> (i32, i32, i32) {
    %c0_i32 = arith.constant 0 : i32
    %c0_i32_0 = arith.constant 0 : i32
    return %arg0, %arg1, %c0_i32 : i32, i32, i32
  }
  func.func @transform_1(%arg0: i32, %arg1: i32) -> (i32, i32) {
    %c0_i32 = arith.constant 0 : i32
    %c0_i32_0 = arith.constant 0 : i32
    %c0_i32_1 = arith.constant 0 : i32
    return %c0_i32, %c0_i32_0 : i32, i32
  }
  func.func @transform_2(%arg0: i32, %arg1: i32) -> (i32, i32) {
    %c0_i32 = arith.constant 0 : i32
    %c0_i32_0 = arith.constant 0 : i32
    %c0_i32_1 = arith.constant 0 : i32
    return %c0_i32, %c0_i32_0 : i32, i32
  }
  func.func @transform_3(%arg0: i32, %arg1: i32) -> (i32, i32) {
    %c0_i32 = arith.constant 0 : i32
    %c0_i32_0 = arith.constant 0 : i32
    return %arg0, %c0_i32 : i32, i32
  }
}

</mosaic_0001>

<bundles_post_ra>
// kernel: tpu_custom_call.1
= control target key start
LH: loop header
LB: loop body
LE: loop exit
PB: predicated region body
PF: predicated region fallthrough
CT: control target
= control target key end

     0   :  { %8 = vsyncpa [#allocation4], 0  ;;  %s270_s0 = inlined_call_operand.hbm [shape: f32[2,8,32], index: 0, kind: input, shape index: {}]   ;;  %s271_s1 = inlined_call_operand.hbm [shape: f32[32,128], index: 1, kind: input, shape index: {}]   ;;  %s272_s2 = inlined_call_operand.vmem [shape: f32[1,128], index: 2, kind: input, shape index: {}]   ;;  %s273_s3 = inlined_call_operand.hbm [shape: f32[2,128], index: 3, kind: output, shape index: {}]  }
   0x1   :  { %9 = vsyncpa [#allocation7], 0 }
   0x2   :  { %10 = vsyncpa [#allocation5], 0  ;;  %s15_s14 = sshll.u32 %s270_s0, 4  ;;  %s225_s15 = smov [#allocation3]   ;;  %s16_s14 = int_to_ptr.hbm [resolvable:$true] %s15_s14 }
   0x3   :  { %s17_s16 = sshll.u32 %s225_s15, 4  ;;  %s28_s19 = sshll.u32 %s271_s1, 4  ;;  %s18_s16 = int_to_ptr.vmem [resolvable:$true] %s17_s16  ;;  %s29_s19 = int_to_ptr.hbm [resolvable:$true] %s28_s19 }
   0x4   :  { %s226_s20 = smov 128   ;;  %s227_s21 = smov 8  }
   0x5   :  { %23 = dma.hbm_to_vmem [thread:$0]  %s16_s14, 256, %s18_s16, [#allocation4], %s226_s20, %s226_s20, %s227_s21  }
   0x6   :  { %s228_s22 = smov [#allocation6]  }
   0x7   :  { %s30_s23 = sshll.u32 %s228_s22, 4  ;;  %s31_s23 = int_to_ptr.vmem [resolvable:$true] %s30_s23 }
   0x8   :  { %36 = dma.hbm_to_vmem [thread:$0]  %s29_s19, 512, %s31_s23, [#allocation7], %s226_s20, %s226_s20, %s227_s21  }
   0x9   :  { %219 = dma.done.wait [#allocation4], 256  }
   0xa   :  { %220 = vsyncadd [#allocation4], 4294967040 }
   0xb   :  { %221 = dma.done.wait [#allocation7], 512  }
   0xc   :  { %222 = vsyncadd [#allocation7], 4294966784  ;;  %vm51_vm0 = vcmask 261120   ;;  %v229_v0 = vmov 0.0   ;;  %v89_v1 = vld [vmem:[#allocation6 + $0x18] sm:$0xff]  ;;  %v88_v2 = vld [vmem:[#allocation6 + $0x10] sm:$0xff] }
   0xd   :  { %52 = vst.msk [vmem:[#allocation2] sm:$0xff] %vm51_vm0, %v229_v0  ;;  %112 = vmatpush.msra.mxu0 %v89_v1  ;;  %v87_v3 = vld [vmem:[#allocation6 + $0x8] sm:$0xff]  ;;  %v54_v4 = vld [vmem:[#allocation3] sm:$0xff]  ;;  %v55_v5 = vld [vmem:[#allocation3 + $0x8] sm:$0xff]  ;;  %vm96_vm1 = vcmask 1041409   ;;  %s230_s24 = smov [#allocation8]  }
   0xe   :  { %53 = vst.msk [vmem:[#allocation2 + $0x8] sm:$0xff] %vm51_vm0, %v229_v0  ;;  %v86_v10 = vld [vmem:[#allocation6] sm:$0xff]  ;;  %s126_s25 = sshll.u32 %s230_s24, 4  ;;  %s128_s28 = sshll.u32 %s273_s3, 4  ;;  %s127_s25 = int_to_ptr.vmem [resolvable:$true] %s126_s25  ;;  %s129_s28 = int_to_ptr.hbm [resolvable:$true] %s128_s28 }
   0xf   :  { %113 = vmatpush.msra.mxu0 %v88_v2  ;;  %v146_v30 = vld [vmem:[%s272_s2] ss:$0 sm:$0xff] }
  0x11   :  { %114 = vmatpush.msra.mxu0 %v87_v3 }
  0x13   :  { %115 = vmatpush.msra.mxu0 %v86_v10 }
  0x14   :  { %v56_v6 = vld [vmem:[#allocation2] sm:$0xff] }
  0x15   :  { %v57_v7 = vld [vmem:[#allocation2 + $0x8] sm:$0xff]  ;;  %v60_v8 = vadd.f32 %v56_v6, %v54_v4 }
  0x16   :  { %v61_v9 = vadd.f32 %v57_v7, %v55_v5 }
  0x17   :  { %63 = vst.msk [vmem:[#allocation2] sm:$0xff] %vm51_vm0, %v60_v8 }
  0x18   :  { %64 = vst.msk [vmem:[#allocation2 + $0x8] sm:$0xff] %vm51_vm0, %v61_v9 }
  0x1e   :  { %v68_v11 = vld [vmem:[#allocation2] sm:$0xff] }
  0x1f   :  { %v69_v12 = vld [vmem:[#allocation2 + $0x8] sm:$0xff]  ;;  %v70_v13 = vsel %vm51_vm0, %v68_v11, 0.0 }
  0x20   :  { %v71_v14 = vrot.slane %v70_v13, 4  ;;  %v77_v15 = vsel %vm51_vm0, %v69_v12, 0.0 }
  0x21   :  { %v78_v16 = vrot.slane %v77_v15, 4 }
  0x22   :  { %v72_v17 = vadd.f32 %v71_v14, %v70_v13 }
  0x23   :  { %v79_v18 = vadd.f32 %v78_v16, %v77_v15 }
  0x24   :  { %v73_v19 = vrot.slane %v72_v17, 2 }
  0x25   :  { %v80_v20 = vrot.slane %v79_v18, 2 }
  0x26   :  { %v74_v21 = vadd.f32 %v73_v19, %v72_v17 }
  0x27   :  { %v81_v22 = vadd.f32 %v80_v20, %v79_v18 }
  0x28   :  { %v75_v23 = vrot.slane %v74_v21, 1 }
  0x29   :  { %v82_v24 = vrot.slane %v81_v22, 1 }
  0x2a   :  { %v76_v25 = vadd.f32 %v75_v23, %v74_v21 }
  0x2b   :  { %v83_v26 = vadd.f32 %v82_v24, %v81_v22 }
  0x2c   :  { %v84_v27 = vmul.f32 0.125, %v76_v25 }
  0x2d   :  { %v85_v28 = vmul.f32 0.125, %v83_v26 }
  0x2f   :  { %v97_v29 = vsel %vm96_vm1, %v85_v28, %v84_v27 }
  0x30   :  { %139 = vmatmul.msk.f32.vlgmr.msra.gmra.mxu0 %vm51_vm0, %v97_v29 }
  0xad   :  { %v117_v31 = vpop.f32.mrf.mxu0 }
  0xae   :  { %v118_v32 = vadd.f32 %v146_v30, %v117_v31 }
  0xb0   :  { %120 = vst [vmem:[#allocation8] sm:$0x3] %v118_v32 }
  0xb1   :  { %131 = dma.vmem_to_hbm [thread:$0]  %s127_s25, 32, %s129_s28, [#allocation5]  }
  0xb2   :  { %223 = dma.done.wait [#allocation5], 32  }
  0xb3   :  { %224 = vsyncadd [#allocation5], 4294967264 }
  0xb4   :  { %136 = vsyncpa [#allocation4], 1 }
  0xb5   :  { %137 = vsyncpa [#allocation7], 1 }
  0xb6   :  { %138 = vsyncpa [#allocation5], 1 }

</bundles_post_ra>
